<compile_context>
chip_gen: v7x
topology: tpu7x:2x2x1
jax: 0.10.0
libtpu: 0.0.40
codegen_flags: <defaults>
</compile_context>

<pallas_src>
import functools

import jax
import jax.numpy as jnp
from jax import lax
from jax.experimental import pallas as pl
from jax.experimental.pallas import tpu as pltpu


TEMPERATURE = 8.0
_MASK_FILL = -1.0e9     # matches torch masked_fill_(mask == 0, -1e9)
_CROSS_FILL = -1.0e30   # cross-instance bias: exp() underflows to exactly 0.0 in f32


def _round_up(n, m):
    return ((n + m - 1) // m) * m


def _attn_body(x, w, bias, dq_pad, dk_pad, dv, approx):
    """Attention on one folded batch chunk, fully resident in VMEM.

    x:    (M, Din) compute dtype, M = instances_in_chunk * N
    w:    (Din, dq_pad + dk_pad + dv_pad) fused/padded QKV weight (1/T folded into Q)
    bias: (M, M) f32 additive bias (block-diagonal -1e30 cross-instance entries
          plus the user mask as 0 / -1e9), or None.
    Returns (M, dv) f32.
    """
    # One lane-dense projection matmul (f32 accumulation on the MXU).
    qkv = jnp.dot(x, w, preferred_element_type=jnp.float32)        # (M, Wtot) f32
    # 128-aligned lane slices -> no relayout copies.
    q = qkv[:, :dq_pad]
    k = qkv[:, dq_pad:dq_pad + dk_pad]
    v = qkv[:, dq_pad + dk_pad:]

    # q @ k^T by contracting the last dims (k consumed as the transposed MXU
    # operand - no XLU transpose). bf16/f32 operands, f32 accumulation.
    s = lax.dot_general(q.astype(x.dtype), k.astype(x.dtype),
                        dimension_numbers=(((1,), (1,)), ((), ())),
                        preferred_element_type=jnp.float32)        # (M, M) f32

    if bias is not None:
        s = s + bias                                               # single VPU add

    # Numerically stable softmax, kept in f32 (v5e VPU/EUP have no bf16).
    s = s - jnp.max(s, axis=-1, keepdims=True)
    e = jnp.exp(s)
    p = e * pl.reciprocal(jnp.sum(e, axis=-1, keepdims=True), approx=approx)

    out = jnp.dot(p.astype(x.dtype), v.astype(x.dtype),
                  preferred_element_type=jnp.float32)              # (M, dv_pad) f32
    return out[:, :dv]                                             # drop zero pad cols


def _kernel_nobias(dq_pad, dk_pad, dv, approx, x_ref, w_ref, o_ref):
    o_ref[...] = _attn_body(x_ref[...], w_ref[...], None,
                            dq_pad, dk_pad, dv, approx).astype(o_ref.dtype)


def _kernel_bias(dq_pad, dk_pad, dv, approx, x_ref, w_ref, b_ref, o_ref):
    o_ref[...] = _attn_body(x_ref[...], w_ref[...], b_ref[...],
                            dq_pad, dk_pad, dv, approx).astype(o_ref.dtype)


def atten_module_forward(x, query_weight, key_weight, value_weight, mask=None, *,
                         precision="bf16", approx_softmax=None,
                         max_rows_per_block=512):
    """JAX/Pallas equivalent of atten_module.forward (inference mode).

    x may be (N, Din) (original single-instance module semantics) or
    (B, N, Din): a batch of independent instances folded into one kernel block
    (chunked over a grid only for large B).
    precision: "bf16" (MXU operands bf16, f32 accumulation - fast path) or "f32".
    Note: the default bf16 path uses the EUP approx reciprocal, so softmax rows
    do not sum to exactly 1 (well inside the bf16 tolerance).
    """
    if approx_softmax is None:
        approx_softmax = (precision == "bf16")
    compute_dtype = jnp.bfloat16 if precision == "bf16" else jnp.float32

    squeeze = (x.ndim == 2)
    x3 = x[None] if squeeze else x
    B, N, Din = x3.shape
    Dq = query_weight.shape[1]
    Dk = key_weight.shape[1]
    Dv = value_weight.shape[1]

    # Fused QKV weight; each segment zero-padded to a 128-lane boundary so the
    # in-kernel slices of the projection are lane-tile aligned.  1/temperature
    # is a power of two, so folding it into the Q segment is bit-exact.
    Dq_pad = _round_up(Dq, 128)
    Dk_pad = _round_up(Dk, 128)
    Dv_pad = _round_up(Dv, 128)
    wq = jnp.pad(query_weight.astype(jnp.float32) * (1.0 / TEMPERATURE),
                 ((0, 0), (0, Dq_pad - Dq)))
    wk = jnp.pad(key_weight.astype(jnp.float32), ((0, 0), (0, Dk_pad - Dk)))
    wv = jnp.pad(value_weight.astype(jnp.float32), ((0, 0), (0, Dv_pad - Dv)))
    w_fused = jnp.concatenate([wq, wk, wv], axis=1).astype(compute_dtype)

    # Fold the batch: whole batch is one block at small B; for large B pick the
    # largest chunk that divides B, keeps (8,128) block alignment and keeps the
    # (chunk_rows)^2 resident score tile modest.
    Bblk = B
    max_inst = max(1, max_rows_per_block // max(N, 1))
    if B > max_inst:
        for cand in range(max_inst, 0, -1):
            if B % cand == 0 and (cand * N) % 8 == 0:
                Bblk = cand
                break
    n_chunks = B // Bblk
    Mblk = Bblk * N

    x2 = x3.reshape(B * N, Din).astype(compute_dtype)   # free reshape in XLA

    in_specs = [
        pl.BlockSpec((Mblk, Din), lambda i: (i, 0)),                      # folded x chunk
        pl.BlockSpec((Din, Dq_pad + Dk_pad + Dv_pad), lambda i: (0, 0)),  # resident weight
    ]
    args = [x2, w_fused]

    need_bias = (Bblk > 1) or (mask is not None)
    if need_bias:
        # Additive bias: -1e30 between different instances inside a folded chunk
        # (exp underflows to exactly 0, so per-instance softmax is preserved)
        # plus the user mask as 0 / -1e9.  Note: for a row whose in-instance
        # entries are ALL masked this differs from torch's exact masked_fill
        # (degenerate case; probabilities are ~uniform either way).
        inst = jnp.repeat(jnp.arange(Bblk, dtype=jnp.int32), N)           # (Mblk,)
        cross = inst[:, None] != inst[None, :]
        bias_blk = jnp.where(cross, jnp.float32(_CROSS_FILL), jnp.float32(0.0))
        if mask is not None:
            m3 = mask if mask.ndim == 3 else jnp.broadcast_to(mask[None], (B, N, N))
            user = jnp.where(m3 == 0, jnp.float32(_MASK_FILL), jnp.float32(0.0))
            user = user.reshape(n_chunks, Bblk, N, N)
            eye = jnp.eye(Bblk, dtype=jnp.float32)
            user = jnp.einsum('bc,gbij->gbicj', eye, user).reshape(n_chunks, Mblk, Mblk)
            bias = user + bias_blk[None]
        else:
            bias = jnp.broadcast_to(bias_blk[None], (n_chunks, Mblk, Mblk))
        in_specs.append(pl.BlockSpec((None, Mblk, Mblk), lambda i: (i, 0, 0)))
        args.append(bias)
        kernel = functools.partial(_kernel_bias, Dq_pad, Dk_pad, Dv, approx_softmax)
    else:
        kernel = functools.partial(_kernel_nobias, Dq_pad, Dk_pad, Dv, approx_softmax)

    out = pl.pallas_call(
        kernel,
        out_shape=jax.ShapeDtypeStruct((B * N, Dv), jnp.float32),         # no lane padding
        grid_spec=pltpu.PrefetchScalarGridSpec(
            num_scalar_prefetch=0,
            grid=(n_chunks,),                                             # 1 step at these sizes
            in_specs=in_specs,
            out_specs=pl.BlockSpec((Mblk, Dv), lambda i: (i, 0)),
        ),
        compiler_params=pltpu.CompilerParams(
            # Independent batch chunks.  With the batch folded this is normally
            # a single grid step; core-level splitting only pays for large B.
            dimension_semantics=("parallel",)),
    )(*args)

    out = out.reshape(B, N, Dv)                                           # free reshape
    return out[0] if squeeze else out


def _uniform_init(key, shape, size):
    # matches torch_geometric `uniform(size, tensor)`: U(-1/sqrt(size), 1/sqrt(size))
    bound = 1.0 / jnp.sqrt(jnp.float32(size))
    return jax.random.uniform(key, shape, dtype=jnp.float32,
                              minval=-bound, maxval=bound)


def _reference(x, wq, wk, wv, mask=None):
    q = x @ wq
    k = x @ wk
    v = x @ wv
    attn = (q / TEMPERATURE) @ k.T
    if mask is not None:
        attn = jnp.where(mask == 0, -1.0e9, attn)
    attn = jax.nn.softmax(attn, axis=-1)
    return attn @ v


if __name__ == "__main__":
    key = jax.random.PRNGKey(0)
    k_x, k_q, k_k, k_v, k_m = jax.random.split(key, 5)

    B = 4            # independent attention instances folded into one block
    N = 8            # rows / "tokens" per instance
    INPUT_DIM = 32   # input_dim
    VALUE_DIM = 32   # value_dim = query_dim = key_dim = input_dim (module defaults)

    x = jax.random.normal(k_x, (B, N, INPUT_DIM), dtype=jnp.float32)
    query_weight = _uniform_init(k_q, (INPUT_DIM, VALUE_DIM), INPUT_DIM)
    key_weight = _uniform_init(k_k, (INPUT_DIM, VALUE_DIM), INPUT_DIM)
    value_weight = _uniform_init(k_v, (INPUT_DIM, VALUE_DIM), INPUT_DIM)
    mask = (jax.random.uniform(k_m, (N, N)) > 0.2).astype(jnp.float32)

    ref = jax.vmap(lambda xb: _reference(xb, query_weight, key_weight, value_weight))(x)
    ref_mask = jax.vmap(
        lambda xb: _reference(xb, query_weight, key_weight, value_weight, mask))(x)

    # 1) exact f32 path, batch folded into one block, no mask
    out_f32 = jax.block_until_ready(
        atten_module_forward(x, query_weight, key_weight, value_weight, precision="f32"))
    assert out_f32.shape == (B, N, VALUE_DIM)
    assert jnp.allclose(out_f32, ref, atol=1e-5, rtol=1e-5), (
        f"f32 max abs err = {jnp.max(jnp.abs(out_f32 - ref))}")

    # 2) exact f32 path with a shared (N, N) mask (additive-bias handling)
    out_mask = jax.block_until_ready(
        atten_module_forward(x, query_weight, key_weight, value_weight,
                             mask=mask, precision="f32"))
    assert jnp.allclose(out_mask, ref_mask, atol=1e-5, rtol=1e-5), (
        f"masked f32 max abs err = {jnp.max(jnp.abs(out_mask - ref_mask))}")

    # 3) original single-instance (2-D x) module signature
    out_2d = jax.block_until_ready(
        atten_module_forward(x[0], query_weight, key_weight, value_weight,
                             precision="f32"))
    assert out_2d.shape == (N, VALUE_DIM)
    assert jnp.allclose(out_2d, ref[0], atol=1e-5, rtol=1e-5)

    # 4) fast path (default): bf16 MXU operands everywhere + approx softmax reciprocal
    out_bf16 = jax.block_until_ready(
        atten_module_forward(x, query_weight, key_weight, value_weight))
    assert out_bf16.shape == (B, N, VALUE_DIM)
    assert jnp.allclose(out_bf16, ref, atol=3e-2, rtol=3e-2), (
        f"bf16 max abs err = {jnp.max(jnp.abs(out_bf16 - ref))}")

    print("KERNEL_OK")
</pallas_src>

<mosaic_0001>
module attributes {stable_mosaic.version = 11 : i64} {
  func.func @_kernel_bias(%arg0: i32, %arg1: memref<32x32xf32, #tpu.memory_space<vmem>>, %arg2: memref<32x384xf32, #tpu.memory_space<vmem>>, %arg3: memref<1x32x32xf32, #tpu.memory_space<vmem>>, %arg4: memref<32x32xf32, #tpu.memory_space<vmem>>) attributes {dimension_semantics = [#tpu.dimension_semantics<parallel>], iteration_bounds = array<i64: 1>, scalar_prefetch = 0 : i64, scratch_operands = 0 : i64, tpu.core_type = #tpu.core_type<tc>, window_params = [{transform_indices = @transform_0, window_bounds = array<i64: 32, 32>}, {pipeline_mode = #tpu.pipeline_mode<synchronous>, transform_indices = @transform_1, window_bounds = array<i64: 32, 384>}, {transform_indices = @transform_2, window_bounds = array<i64: 1, 32, 32>}, {transform_indices = @transform_3, window_bounds = array<i64: 32, 32>}]} {
    %c0 = arith.constant 0 : index
    %c0_0 = arith.constant 0 : index
    %0 = vector.load %arg1[%c0, %c0_0] : memref<32x32xf32, #tpu.memory_space<vmem>>, vector<32x32xf32>
    %c0_1 = arith.constant 0 : index
    %c0_2 = arith.constant 0 : index
    %1 = vector.load %arg2[%c0_1, %c0_2] : memref<32x384xf32, #tpu.memory_space<vmem>>, vector<32x384xf32>
    %c0_3 = arith.constant 0 : index
    %c0_4 = arith.constant 0 : index
    %c0_5 = arith.constant 0 : index
    %2 = vector.load %arg3[%c0_3, %c0_4, %c0_5] : memref<1x32x32xf32, #tpu.memory_space<vmem>>, vector<1x32x32xf32>
    %3 = vector.shape_cast %2 : vector<1x32x32xf32> to vector<32x32xf32>
    %cst = arith.constant dense<0.000000e+00> : vector<32x384xf32>
    %4 = tpu.matmul %0, %1, %cst {dimension_numbers = #tpu.dot_dimension_numbers<[1], [0], [0], [1], [0, 0, 1, 1], [], []>} : vector<32x32xf32>, vector<32x384xf32>, vector<32x384xf32> -> vector<32x384xf32>
    %5 = vector.extract_strided_slice %4 {offsets = [0, 0], sizes = [32, 128], strides = [1, 1]} : vector<32x384xf32> to vector<32x128xf32>
    %6 = vector.extract_strided_slice %4 {offsets = [0, 128], sizes = [32, 128], strides = [1, 1]} : vector<32x384xf32> to vector<32x128xf32>
    %7 = vector.extract_strided_slice %4 {offsets = [0, 256], sizes = [32, 128], strides = [1, 1]} : vector<32x384xf32> to vector<32x128xf32>
    %cst_6 = arith.constant dense<0.000000e+00> : vector<32x32xf32>
    %8 = tpu.matmul %5, %6, %cst_6 {dimension_numbers = #tpu.dot_dimension_numbers<[1], [1], [0], [0], [0, 0, 1, 0], [], []>} : vector<32x128xf32>, vector<32x128xf32>, vector<32x32xf32> -> vector<32x32xf32>
    %9 = arith.addf %8, %3 : vector<32x32xf32>
    %cst_7 = arith.constant dense<0xFF800000> : vector<32xf32>
    %10 = vector.multi_reduction <maximumf>, %9, %cst_7 [1] : vector<32x32xf32> to vector<32xf32>
    %11 = vector.shape_cast %10 : vector<32xf32> to vector<32x1xf32>
    %12 = vector.broadcast %11 : vector<32x1xf32> to vector<32x32xf32>
    %13 = arith.subf %9, %12 : vector<32x32xf32>
    %14 = math.exp %13 : vector<32x32xf32>
    %cst_8 = arith.constant dense<0.000000e+00> : vector<32xf32>
    %15 = vector.multi_reduction <add>, %14, %cst_8 [1] : vector<32x32xf32> to vector<32xf32>
    %16 = vector.shape_cast %15 : vector<32xf32> to vector<32x1xf32>
    %17 = tpu.reciprocal %16 : vector<32x1xf32> -> vector<32x1xf32>
    %18 = vector.broadcast %17 : vector<32x1xf32> to vector<32x32xf32>
    %19 = arith.mulf %14, %18 : vector<32x32xf32>
    %cst_9 = arith.constant dense<0.000000e+00> : vector<32x128xf32>
    %20 = tpu.matmul %19, %7, %cst_9 {dimension_numbers = #tpu.dot_dimension_numbers<[1], [0], [0], [1], [0, 0, 1, 1], [], []>} : vector<32x32xf32>, vector<32x128xf32>, vector<32x128xf32> -> vector<32x128xf32>
    %21 = vector.extract_strided_slice %20 {offsets = [0, 0], sizes = [32, 32], strides = [1, 1]} : vector<32x128xf32> to vector<32x32xf32>
    %c0_10 = arith.constant 0 : index
    %c0_11 = arith.constant 0 : index
    %22 = vector.load %arg4[%c0_10, %c0_11] : memref<32x32xf32, #tpu.memory_space<vmem>>, vector<32x32xf32>
    tpu.vector_store %arg4[%c0_10, %c0_11], %21 {strides = array<i32>} : memref<32x32xf32, #tpu.memory_space<vmem>>, vector<32x32xf32>,
    return
  }
  func.func @transform_0(%arg0: i32) -> (i32, i32) {
    %c0_i32 = arith.constant 0 : i32
    %c0_i32_0 = arith.constant 0 : i32
    return %arg0, %c0_i32 : i32, i32
  }
  func.func @transform_1(%arg0: i32) -> (i32, i32) {
    %c0_i32 = arith.constant 0 : i32
    %c0_i32_0 = arith.constant 0 : i32
    %c0_i32_1 = arith.constant 0 : i32
    return %c0_i32, %c0_i32_0 : i32, i32
  }
  func.func @transform_2(%arg0: i32) -> (i32, i32, i32) {
    %c0_i32 = arith.constant 0 : i32
    %c0_i32_0 = arith.constant 0 : i32
    %c0_i32_1 = arith.constant 0 : i32
    return %arg0, %c0_i32, %c0_i32_0 : i32, i32, i32
  }
  func.func @transform_3(%arg0: i32) -> (i32, i32) {
    %c0_i32 = arith.constant 0 : i32
    %c0_i32_0 = arith.constant 0 : i32
    return %arg0, %c0_i32 : i32, i32
  }
}

</mosaic_0001>

<bundles_post_ra>
// kernel: tpu_custom_call.1
= control target key start
LH: loop header
LB: loop body
LE: loop exit
PB: predicated region body
PF: predicated region fallthrough
CT: control target
= control target key end

     0   :  { %8 = vsyncpa [#allocation3], 0  ;;  %s850_s0 = inlined_call_operand.hbm [shape: f32[32,32], index: 0, kind: input, shape index: {}]   ;;  %s851_s1 = inlined_call_operand.hbm [shape: f32[32,384], index: 1, kind: input, shape index: {}]   ;;  %s852_s2 = inlined_call_operand.hbm [shape: f32[1,32,32], index: 2, kind: input, shape index: {}]   ;;  %s853_s3 = inlined_call_operand.hbm [shape: f32[32,32], index: 3, kind: output, shape index: {}]  }
   0x1   :  { %9 = vsyncpa [#allocation6], 0 }
   0x2   :  { %10 = vsyncpa [#allocation4], 0  ;;  %s740_s12 = smov [#allocation5]   ;;  %s646_s16 = scalar_lea.hbm %s851_s1, 1536 }
   0x3   :  { %s28_s13 = sshll.u32 %s740_s12, 4  ;;  %p647_p0 = scmp.ne.s32.totalorder %s851_s1, %s646_s16  ;;  %s29_s13 = int_to_ptr.vmem [resolvable:$true] %s28_s13 }
   0x4   :  { %p650_p1 = scmp.lt.u32.totalorder %s646_s16, %s851_s1 }
   0x6   :  { %p652_p2 = pnand %p650_p1, %p647_p0 }
   0x8   :  { %655 = shalt.err (!%p652_p2)
}
   0x9   :  { %s656_s21 = scalar_lea.vmem %s29_s13, 1536  ;;  %p661_p4 = scmp.lt.s32.totalorder %s29_s13, %s29_s13 }
   0xa   :  { %p657_p3 = scmp.ne.s32.totalorder %s29_s13, %s656_s21  ;;  %p662_p5 = scmp.lt.s32.totalorder %s656_s21, %s656_s21 }
   0xc   :  { %p663_p6 = por %p662_p5, %p661_p4 }
   0xe   :  { %p664_p7 = pnand %p663_p6, %p657_p3 }
  0x10   :  { %667 = shalt.err (!%p664_p7)
}
  0x11   :  { %s741_s22 = smov 384   ;;  %s742_s23 = smov 24  }
  0x12   :  { %34 = dma.hbm_to_vmem [thread:$0]  %s851_s1, 1536, %s29_s13, [#allocation6], %s741_s22, %s741_s22, %s742_s23  }
  0x13   :  { %s743_s26 = smov [#allocation2]   ;;  %s668_s30 = scalar_lea.hbm %s850_s0, 512 }
  0x14   :  { %s16_s27 = sshll.u32 %s743_s26, 4  ;;  %p669_p8 = scmp.ne.s32.totalorder %s850_s0, %s668_s30  ;;  %s17_s27 = int_to_ptr.vmem [resolvable:$true] %s16_s27 }
  0x15   :  { %p672_p9 = scmp.lt.u32.totalorder %s668_s30, %s850_s0 }
  0x17   :  { %p674_p10 = pnand %p672_p9, %p669_p8 }
  0x19   :  { %677 = shalt.err (!%p674_p10)
}
  0x1a   :  { %s678_s8 = scalar_lea.vmem %s17_s27, 512  ;;  %p683_p12 = scmp.lt.s32.totalorder %s17_s27, %s17_s27 }
  0x1b   :  { %p679_p11 = scmp.ne.s32.totalorder %s17_s27, %s678_s8  ;;  %p684_p13 = scmp.lt.s32.totalorder %s678_s8, %s678_s8 }
  0x1d   :  { %p685_p0 = por %p684_p13, %p683_p12 }
  0x1f   :  { %p686_p1 = pnand %p685_p0, %p679_p11 }
  0x21   :  { %689 = shalt.err (!%p686_p1)
}
  0x22   :  { %s744_s1 = smov 128   ;;  %s745_s9 = smov 8  }
  0x23   :  { %22 = dma.hbm_to_vmem [thread:$0]  %s850_s0, 512, %s17_s27, [#allocation3], %s744_s1, %s744_s1, %s745_s9  }
  0x24   :  { %s746_s12 = smov [#allocation7]   ;;  %s690_s16 = scalar_lea.hbm %s852_s2, 512 }
  0x25   :  { %s40_s13 = sshll.u32 %s746_s12, 4  ;;  %p691_p2 = scmp.ne.s32.totalorder %s852_s2, %s690_s16  ;;  %s41_s13 = int_to_ptr.vmem [resolvable:$true] %s40_s13 }
  0x26   :  { %p694_p3 = scmp.lt.u32.totalorder %s690_s16, %s852_s2 }
  0x28   :  { %p696_p4 = pnand %p694_p3, %p691_p2 }
  0x2a   :  { %699 = shalt.err (!%p696_p4)
}
  0x2b   :  { %s700_s21 = scalar_lea.vmem %s41_s13, 512  ;;  %p705_p6 = scmp.lt.s32.totalorder %s41_s13, %s41_s13 }
  0x2c   :  { %p701_p5 = scmp.ne.s32.totalorder %s41_s13, %s700_s21  ;;  %p706_p7 = scmp.lt.s32.totalorder %s700_s21, %s700_s21 }
  0x2e   :  { %p707_p8 = por %p706_p7, %p705_p6 }
  0x30   :  { %p708_p9 = pnand %p707_p8, %p701_p5 }
  0x32   :  { %711 = shalt.err (!%p708_p9)
}
  0x33   :  { %46 = dma.hbm_to_vmem [thread:$0]  %s852_s2, 512, %s41_s13, [#allocation6], %s744_s1, %s744_s1, %s745_s9  }
  0x34   :  { %734 = dma.done.wait [#allocation3], 512  }
  0x35   :  { %735 = vsyncadd [#allocation3], 4294966784 }
  0x36   :  { %736 = dma.done.wait [#allocation6], 2048  }
  0x37   :  { %737 = vsyncadd [#allocation6], 4294965248  ;;  %v747_v0 = vmov 0.0   ;;  %v61_v1 = vld [vmem:[#allocation5 + $0x8] sm:$0xff]  ;;  %v64_v2 = vld [vmem:[#allocation5 + $0x20] sm:$0xff]  ;;  %vm76_vm0 = vcmask 261120  }
  0x38   :  { %153 = vmatprep.mubr.f32.mxu0 %v747_v0  ;;  %v60_v3 = vld [vmem:[#allocation5] sm:$0xff]  ;;  %v589_v4 = vpack.c.bf16 %v64_v2, %v61_v1  ;;  %v63_v5 = vld [vmem:[#allocation5 + $0x18] sm:$0xff]  ;;  %v70_v7 = vld [vmem:[#allocation5 + $0x50] sm:$0xff]  ;;  %s748_s2 = smov [#allocation8]  }
  0x39   :  { %v67_v6 = vld [vmem:[#allocation5 + $0x38] sm:$0xff]  ;;  %v591_v8 = vpack.c.bf16 %v63_v5, %v60_v3  ;;  %v66_v10 = vld [vmem:[#allocation5 + $0x30] sm:$0xff]  ;;  %v69_v11 = vld [vmem:[#allocation5 + $0x48] sm:$0xff]  ;;  %s498_s23 = sshll.u32 %s748_s2, 4  ;;  %s499_s23 = int_to_ptr.vmem [resolvable:$true] %s498_s23 }
  0x3a   :  { %v593_v9 = vpack.c.bf16 %v70_v7, %v67_v6  ;;  %v56_v12 = vld [vmem:[#allocation2] sm:$0xff]  ;;  %590 = vmatprep.subr.bf16.mxu0 %v589_v4  ;;  %v595_v13 = vpack.c.bf16 %v69_v11, %v66_v10  ;;  %v57_v14 = vld [vmem:[#allocation2 + $0x8] sm:$0xff]  ;;  %v58_v15 = vld [vmem:[#allocation2 + $0x10] sm:$0xff]  ;;  %s712_s24 = scalar_lea.vmem %s499_s23, 512  ;;  %p717_p11 = scmp.lt.s32.totalorder %s499_s23, %s499_s23 }
  0x3b   :  { %555 = vmatprep.mubr.msk.f32.mxu1 %vm76_vm0, %v56_v12  ;;  %592 = vmatpush1.bf16.msra.mxu0 %v591_v8  ;;  %v59_v16 = vld [vmem:[#allocation2 + $0x18] sm:$0xff]  ;;  %v62_v27 = vld [vmem:[#allocation5 + $0x10] sm:$0xff]  ;;  %v65_v28 = vld [vmem:[#allocation5 + $0x28] sm:$0xff]  ;;  %p713_p10 = scmp.ne.s32.totalorder %s499_s23, %s712_s24  ;;  %p718_p12 = scmp.lt.s32.totalorder %s712_s24, %s712_s24 }
  0x3c   :  { %594 = vmatprep.subr.bf16.mxu0 %v593_v9  ;;  %v68_v29 = vld [vmem:[#allocation5 + $0x40] sm:$0xff]  ;;  %v597_v30 = vpack.c.bf16 %v65_v28, %v62_v27  ;;  %v71_v31 = vld [vmem:[#allocation5 + $0x58] sm:$0xff]  ;;  %v73_v35 = vld [vmem:[#allocation7 + $0x8] sm:$0xff] }
  0x3d   :  { %v601_v32 = vpack.c.bf16 %v71_v31, %v68_v29  ;;  %v72_v33 = vld [vmem:[#allocation7] sm:$0xff]  ;;  %v74_v38 = vld [vmem:[#allocation7 + $0x10] sm:$0xff]  ;;  %v75_v42 = vld [vmem:[#allocation7 + $0x18] sm:$0xff]  ;;  %p719_p13 = por %p718_p12, %p717_p11 }
  0x3e   :  { %598 = vmatprep.subr.bf16.mxu1 %v597_v30 }
  0x3f   :  { %596 = vmatpush1.bf16.msra.mxu0 %v595_v13  ;;  %600 = vmatpush3.bf16.msra.mxu1 %v597_v30  ;;  %p720_p0 = pnand %p719_p13, %p713_p10 }
  0x40   :  { %602 = vmatprep.subr.bf16.mxu1 %v601_v32 }
  0x42   :  { %511 = vmatmul.mubr.msk.f32.vlgmr.msra.gmra.mrb[0].mxu0 %vm76_vm0, %v56_v12 }
  0x43   :  { %159 = vmatprep.mubr.f32.mxu0 %v747_v0  ;;  %604 = vmatpush3.bf16.msra.mxu1 %v601_v32 }
  0x46   :  { %512 = vmatmul.mubr.msk.f32.gmra.mrb[2].mxu0 %vm76_vm0, %v57_v14  ;;  %556 = vmatmul.mubr.msk.f32.vlgmr.msra.gmra.mrb[0].mxu1 %vm76_vm0, %v57_v14 }
  0x47   :  { %165 = vmatprep.mubr.f32.mxu0 %v747_v0  ;;  %558 = vmatprep.mubr.msk.f32.mxu1 %vm76_vm0, %v58_v15 }
  0x4a   :  { %513 = vmatmul.mubr.msk.f32.gmra.mrb[4].mxu0 %vm76_vm0, %v58_v15  ;;  %559 = vmatmul.mubr.msk.f32.gmra.mrb[2].mxu1 %vm76_vm0, %v59_v16 }
  0x4b   :  { %171 = vmatprep.mubr.f32.mxu0 %v747_v0 }
  0x4e   :  { %514 = vmatmul.mubr.msk.f32.gmra.mrb[6].mxu0 %vm76_vm0, %v59_v16 }
 0x115   :  { %v155_v17 = vpop.f32.mrb[0].mxu0 }
 0x116   :  { %v157_v18 = vpop.f32.mrb[1].mxu0  ;;  %569 = vmatprep.mubr.f32.mxu0 %v155_v17 }
 0x119   :  { %v161_v19 = vpop.f32.mrb[2].mxu0  ;;  %v557_v5 = vpop.f32.mrb[0].mxu1 }
 0x11a   :  { %v163_v20 = vpop.f32.mrb[3].mxu0  ;;  %v244_v6 = vpop.f32.mrb[1].mxu1 }
 0x11b   :  { %v605_v21 = vpack.c.bf16 %v163_v20, %v157_v18  ;;  %v613_v7 = vpack.c.bf16 %v557_v5, %v244_v6 }
 0x11d   :  { %v167_v22 = vpop.f32.mrb[4].mxu0  ;;  %606 = vmatprep.subr.bf16.mxu0 %v605_v21  ;;  %v560_v8 = vpop.f32.mrb[2].mxu1  ;;  %614 = vmatprep.subr.bf16.mxu1 %v613_v7 }
 0x11e   :  { %v169_v23 = vpop.f32.mrb[5].mxu0  ;;  %608 = vmatpush3.bf16.xpose.msra.mxu0 %v605_v21  ;;  %v254_v9 = vpop.f32.mrb[3].mxu1  ;;  %616 = vmatpush3.bf16.msra.mxu1 %v613_v7 }
 0x11f   :  { %v617_v10 = vpack.c.bf16 %v560_v8, %v254_v9 }
 0x121   :  { %v173_v24 = vpop.f32.mrb[6].mxu0  ;;  %618 = vmatprep.subr.bf16.mxu1 %v617_v10 }
 0x122   :  { %v175_v25 = vpop.f32.mrb[7].mxu0  ;;  %620 = vmatpush3.bf16.msra.mxu1 %v617_v10 }
 0x123   :  { %v609_v26 = vpack.c.bf16 %v175_v25, %v169_v23 }
 0x125   :  { %610 = vmatprep.subr.bf16.mxu0 %v609_v26 }
 0x126   :  { %612 = vmatpush3.bf16.xpose.msra.mxu0 %v609_v26 }
 0x12d   :  { %570 = vmatmul.mubr.f32.vlgmr.msra.gmra.mrb[8].mxu0 %v161_v19 }
 0x12e   :  { %572 = vmatprep.mubr.f32.mxu0 %v167_v22 }
 0x131   :  { %573 = vmatmul.mubr.f32.gmra.mrb[10].mxu0 %v173_v24 }
 0x200   :  { %v571_v34 = vpop.f32.mrb[8].mxu0 }
 0x201   :  { %v329_v36 = vpop.f32.mrb[9].mxu0  ;;  %v335_v39 = vadd.f32 %v571_v34, %v73_v35 }
 0x202   :  { %v330_v37 = vadd.f32 %v329_v36, %v72_v33 }
 0x203   :  { %v351_v47 = vsel %vm76_vm0, %v335_v39, -inf }
 0x204   :  { %v574_v40 = vpop.f32.mrb[10].mxu0  ;;  %v348_v41 = vsel %vm76_vm0, %v330_v37, -inf }
 0x205   :  { %v339_v43 = vpop.f32.mrb[11].mxu0  ;;  %349 = vmax.xlane.f32.xlu0 %v348_v41  ;;  %v345_v45 = vadd.f32 %v574_v40, %v75_v42 }
 0x206   :  { %v340_v44 = vadd.f32 %v339_v43, %v74_v38 }
 0x207   :  { %v357_v48 = vsel %vm76_vm0, %v345_v45, -inf }
 0x208   :  { %v354_v46 = vsel %vm76_vm0, %v340_v44, -inf }
 0x209   :  { %355 = vmax.xlane.f32.xlu1 %v354_v46  ;;  %352 = vmax.xlane.f32.xlu0 %v351_v47 }
 0x20d   :  { %358 = vmax.xlane.f32.xlu1 %v357_v48 }
 0x292   :  { %v350_v49 = vpop.xlane.xlu0 %349 }
 0x293   :  { %v360_v50 = vsub.f32 %v330_v37, %v350_v49 }
 0x295   :  { %v364_v51 = vmul.f32 1.442695, %v360_v50 }
 0x296   :  { %v356_v52 = vpop.xlane.xlu1 %355  ;;  %v353_v53 = vpop.xlane.xlu0 %352 }
 0x297   :  { %630 = vpow2.f32 %v364_v51  ;;  %v362_v54 = vsub.f32 %v340_v44, %v356_v52  ;;  %v361_v55 = vsub.f32 %v335_v39, %v353_v53 }
 0x299   :  { %v368_v56 = vmul.f32 1.442695, %v362_v54  ;;  %v366_v57 = vmul.f32 1.442695, %v361_v55 }
 0x29a   :  { %v359_v58 = vpop.xlane.xlu1 %358 }
 0x29b   :  { %632 = vpow2.f32 %v368_v56  ;;  %v363_v59 = vsub.f32 %v345_v45, %v359_v58 }
 0x29c   :  { %634 = vpow2.f32 %v366_v57 }
 0x29d   :  { %v370_v60 = vmul.f32 1.442695, %v363_v59 }
 0x29f   :  { %636 = vpow2.f32 %v370_v60 }
 0x2a1   :  { %v631_v61 = vpop.eup %630 }
 0x2a2   :  { %v372_v62 = vsel %vm76_vm0, %v631_v61, 0.0 }
 0x2a3   :  { %373 = vadd.xlane.f32.xlu0 %v372_v62 }
 0x2a5   :  { %v633_v63 = vpop.eup %632 }
 0x2a6   :  { %v635_v0 = vpop.eup %634  ;;  %v378_v1 = vsel %vm76_vm0, %v633_v63, 0.0 }
 0x2a7   :  { %379 = vadd.xlane.f32.xlu0 %v378_v1  ;;  %v375_v2 = vsel %vm76_vm0, %v635_v0, 0.0 }
 0x2a8   :  { %376 = vadd.xlane.f32.xlu1 %v375_v2 }
 0x2a9   :  { %v637_v3 = vpop.eup %636 }
 0x2aa   :  { %v381_v4 = vsel %vm76_vm0, %v637_v3, 0.0 }
 0x2ac   :  { %382 = vadd.xlane.f32.xlu1 %v381_v4 }
 0x330   :  { %v374_v11 = vpop.xlane.xlu0 %373 }
 0x331   :  { %638 = vrcp.f32 %v374_v11 }
 0x334   :  { %v380_v12 = vpop.xlane.xlu0 %379 }
 0x335   :  { %v377_v13 = vpop.xlane.xlu1 %376  ;;  %640 = vrcp.f32 %v380_v12 }
 0x336   :  { %642 = vrcp.f32 %v377_v13 }
 0x339   :  { %v383_v14 = vpop.xlane.xlu1 %382 }
 0x33a   :  { %644 = vrcp.f32 %v383_v14 }
 0x33b   :  { %v639_v15 = vpop.eup %638 }
 0x33c   :  { %v388_v16 = vmul.f32 %v639_v15, %v631_v61 }
 0x33e   :  { %583 = vmatprep.mubr.msk.f32.mxu1 %vm76_vm0, %v388_v16 }
 0x33f   :  { %v641_v17 = vpop.eup %640 }
 0x340   :  { %v643_v18 = vpop.eup %642  ;;  %v390_v19 = vmul.f32 %v641_v17, %v633_v63 }
 0x341   :  { %v389_v20 = vmul.f32 %v643_v18, %v635_v0 }
 0x343   :  { %584 = vmatmul.mubr.msk.f32.vlgmr.msra.gmra.mrb[4].mxu1 %vm76_vm0, %v389_v20 }
 0x344   :  { %v645_v21 = vpop.eup %644  ;;  %586 = vmatprep.mubr.msk.f32.mxu1 %vm76_vm0, %v390_v19 }
 0x345   :  { %v391_v22 = vmul.f32 %v645_v21, %v637_v3 }
 0x347   :  { %587 = vmatmul.mubr.msk.f32.gmra.mrb[6].mxu1 %vm76_vm0, %v391_v22 }
 0x416   :  { %v585_v23 = vpop.f32.mrb[4].mxu1 }
 0x417   :  { %490 = vst.msk [vmem:[#allocation8 + $0x8] sm:$0xff] %vm76_vm0, %v585_v23  ;;  %v470_v24 = vpop.f32.mrb[5].mxu1 }
 0x418   :  { %489 = vst.msk [vmem:[#allocation8] sm:$0xff] %vm76_vm0, %v470_v24 }
 0x41a   :  { %v588_v25 = vpop.f32.mrb[6].mxu1 }
 0x41b   :  { %492 = vst.msk [vmem:[#allocation8 + $0x18] sm:$0xff] %vm76_vm0, %v588_v25  ;;  %v480_v26 = vpop.f32.mrb[7].mxu1 }
 0x41c   :  { %491 = vst.msk [vmem:[#allocation8 + $0x10] sm:$0xff] %vm76_vm0, %v480_v26 }
 0x41d   :  { %723 = shalt.err (!%p720_p0)
}
 0x41e   :  { %s724_s27 = scalar_lea.hbm %s853_s3, 512 }
 0x41f   :  { %p725_p1 = scmp.ne.s32.totalorder %s853_s3, %s724_s27  ;;  %p728_p2 = scmp.lt.u32.totalorder %s724_s27, %s853_s3 }
 0x421   :  { %p730_p3 = pnand %p728_p2, %p725_p1 }
 0x423   :  { %733 = shalt.err (!%p730_p3)
}
 0x424   :  { %504 = dma.vmem_to_hbm [thread:$0]  %s499_s23, 512, %s853_s3, [#allocation4], %s744_s1, %s744_s1, %s745_s9  }
 0x425   :  { %738 = dma.done.wait [#allocation4], 512  }
 0x426   :  { %739 = vsyncadd [#allocation4], 4294966784 }
 0x427   :  { %508 = vsyncpa [#allocation3], 1 }
 0x428   :  { %509 = vsyncpa [#allocation6], 1 }
 0x429   :  { %510 = vsyncpa [#allocation4], 1 }

</bundles_post_ra>
